<compile_context>
chip_gen: v6e
topology: v6e:2x2x1
jax: 0.10.0
libtpu: 0.0.40
codegen_flags: <defaults>
</compile_context>

<pallas_src>
import jax
import jax.numpy as jnp
from jax.experimental import pallas as pl
from jax.experimental.pallas import tpu as pltpu


def _hswish(v):
    # h_swish(x) = x * relu6(x + 3) / 6
    return v * jnp.clip(v + 3.0, 0.0, 6.0) * (1.0 / 6.0)


def ca_kernel(x_ref, pool_ref, eh_ref, ew_ref, w1t_ref, b1_ref,
              wht_ref, bh_ref, wwt_ref, bw_ref, out_ref):
    bt, c, hw = x_ref.shape
    h = eh_ref.shape[0]
    w = ew_ref.shape[0]
    cm = w1t_ref.shape[1]

    # All arithmetic in f32 regardless of the HBM I/O dtype.
    x = x_ref[...].astype(jnp.float32)                                # (Bt, C, HW)
    x2d = x.reshape(bt * c, hw)                                       # free leading collapse

    # --- both coordinate average pools in ONE MXU matmul (batch+channel in M)
    # pooled[:, :H] = mean over W (rows) == x_h ; pooled[:, H:] = mean over H == x_w
    pooled = jnp.dot(x2d, pool_ref[...],
                     preferred_element_type=jnp.float32)              # (Bt*C, H+W)

    # --- conv1 (1x1, eval-BN folded) + h_swish as a single 2-D matmul with the
    #     batch folded into M; one small per-block minor-dim transpose (C <-> H+W).
    pooled_t = jnp.swapaxes(pooled.reshape(bt, c, h + w), 1, 2)       # (Bt, H+W, C)
    y = jnp.dot(pooled_t.reshape(bt * (h + w), c), w1t_ref[...],
                preferred_element_type=jnp.float32) + b1_ref[...]     # (Bt*(H+W), Cm)
    y = _hswish(y).reshape(bt, h + w, cm)

    # --- conv_h / conv_w (1x1) + sigmoid, batch folded into M ----------------
    y_h = y[:, :h, :].reshape(bt * h, cm)
    y_w = y[:, h:, :].reshape(bt * w, cm)
    a_h = jax.nn.sigmoid(jnp.dot(y_h, wht_ref[...],
                                 preferred_element_type=jnp.float32) + bh_ref[...])
    a_w = jax.nn.sigmoid(jnp.dot(y_w, wwt_ref[...],
                                 preferred_element_type=jnp.float32) + bw_ref[...])
    # back to channel-on-sublane orientation for gating: (Bt, H|W, C) -> (Bt*C, H|W)
    a_h = jnp.swapaxes(a_h.reshape(bt, h, c), 1, 2).reshape(bt * c, h)
    a_w = jnp.swapaxes(a_w.reshape(bt, w, c), 1, 2).reshape(bt * c, w)

    # --- expand gates to the flat H*W lane axis with exact 0/1 selection
    #     matmuls (MXU) and multiply into x immediately so only one
    #     block-sized gate temporary is live at a time. -----------------------
    t = x2d * jnp.dot(a_h, eh_ref[...], preferred_element_type=jnp.float32)
    t = t * jnp.dot(a_w, ew_ref[...], preferred_element_type=jnp.float32)
    out_ref[...] = t.reshape(bt, c, hw).astype(out_ref.dtype)


def ca_block(x, params, *, io_dtype=None, vmem_budget_bytes=32 << 20):
    """x: (N, C, H, W) float32; params: raw conv/BN params from make_params().

    io_dtype: dtype used for x/out in HBM (jnp.bfloat16 halves memory traffic;
    in-kernel accumulation stays f32). Default: x.dtype (matches PyTorch).
    """
    N, C, H, W = x.shape
    HW = H * W
    f32 = jnp.float32
    io_dtype = x.dtype if io_dtype is None else jnp.dtype(io_dtype)

    # Fold eval-mode BatchNorm into conv1, and pre-transpose all 1x1 weights
    # for the batch-folded (M = Bt*positions) 2-D matmuls inside the kernel.
    # TODO(synk): training-mode BN (batch statistics) is not modeled here.
    w1t = (params["bn_scale"] * params["w1"]).astype(f32).T            # (C, Cm)
    b1r = (params["bn_scale"] * params["b1"]
           + params["bn_shift"]).astype(f32).T                         # (1, Cm)
    wht = params["wh"].astype(f32).T                                   # (Cm, C)
    bhr = params["bh"].astype(f32).T                                   # (1, C)
    wwt = params["ww"].astype(f32).T                                   # (Cm, C)
    bwr = params["bw"].astype(f32).T                                   # (1, C)

    # Constant pooling / gate-expansion matrices (tiny, built once).
    s = jnp.arange(HW)
    eh = (s[None, :] // W == jnp.arange(H)[:, None]).astype(f32)       # (H, HW)
    ew = (s[None, :] % W == jnp.arange(W)[:, None]).astype(f32)        # (W, HW)
    pool = jnp.concatenate([eh.T / W, ew.T / H], axis=1)               # (HW, H+W)

    # Lane-dense layout: contiguous NCHW -> (N, C, H*W) is a free reshape.
    # (Ideally a bf16 producer already supplies bf16 activations.)
    x_flat = x.reshape(N, C, HW).astype(io_dtype)

    # --- block-size heuristic ------------------------------------------------
    # Live VMEM per step ~= 2x-buffered x + 2x-buffered out (io dtype) plus
    # ~4 block-sized f32 temporaries (x_f32, gate, product, store-cast).
    blk_io = C * HW * jnp.dtype(io_dtype).itemsize
    blk_f32 = C * HW * 4
    per_bt = 4 * blk_io + 4 * blk_f32
    bt = int(max(1, min(N, vmem_budget_bytes // per_bt)))
    if N >= 2:
        # Keep the grid >= 2 so both of v7x's TensorCores get work.
        bt = min(bt, -(-N // 2))
    # Prefer an exact divisor of N near the target (avoids a masked tail
    # block) but never degrade bt by more than ~25% chasing divisibility.
    for cand in range(bt, max(1, (3 * bt) // 4) - 1, -1):
        if N % cand == 0:
            bt = cand
            break
    grid = pl.cdiv(N, bt)          # tail block (if any) is masked by Pallas

    vmem_est = per_bt * bt + (2 << 20)                      # + constants & slack
    vmem_limit = int(min(max(vmem_est, 32 << 20), 56 << 20))

    def const2d(arr):
        return pl.BlockSpec(arr.shape, lambda n: (0, 0))

    out_flat = pl.pallas_call(
        ca_kernel,
        out_shape=jax.ShapeDtypeStruct((N, C, HW), io_dtype),
        grid_spec=pltpu.PrefetchScalarGridSpec(
            num_scalar_prefetch=0,
            grid=(grid,),
            in_specs=[
                pl.BlockSpec((bt, C, HW), lambda n: (n, 0, 0)),  # x
                const2d(pool),                                   # pooling matrix
                const2d(eh),                                     # row-gate expansion
                const2d(ew),                                     # col-gate expansion
                const2d(w1t), const2d(b1r),                      # conv1 (BN folded)
                const2d(wht), const2d(bhr),                      # conv_h
                const2d(wwt), const2d(bwr),                      # conv_w
            ],
            out_specs=pl.BlockSpec((bt, C, HW), lambda n: (n, 0, 0)),
        ),
        compiler_params=pltpu.CompilerParams(
            dimension_semantics=("parallel",),
            vmem_limit_bytes=vmem_limit),
    )(x_flat, pool, eh, ew, w1t, b1r, wht, bhr, wwt, bwr)

    return out_flat.reshape(N, C, H, W)


def make_params(key, C, reduction=16):
    Cm = C // reduction
    k1, k2, k3, k4, k5, k6 = jax.random.split(key, 6)
    # 1x1 conv weights (out_ch, in_ch); biases as column vectors.
    w1 = jax.random.normal(k1, (Cm, C), jnp.float32) * 0.1
    b1 = jax.random.normal(k2, (Cm, 1), jnp.float32) * 0.05
    wh = jax.random.normal(k3, (C, Cm), jnp.float32) * 0.1
    bh = jax.random.normal(k4, (C, 1), jnp.float32) * 0.05
    ww = jax.random.normal(k5, (C, Cm), jnp.float32) * 0.1
    bw = jax.random.normal(k6, (C, 1), jnp.float32) * 0.05
    # BatchNorm2d default init, eval mode: gamma=1, beta=0, mean=0, var=1.
    gamma = jnp.ones((Cm, 1), jnp.float32)
    beta = jnp.zeros((Cm, 1), jnp.float32)
    r_mean = jnp.zeros((Cm, 1), jnp.float32)
    r_var = jnp.ones((Cm, 1), jnp.float32)
    eps = 1e-5
    bn_scale = gamma / jnp.sqrt(r_var + eps)
    bn_shift = beta - r_mean * bn_scale
    return dict(w1=w1, b1=b1, bn_scale=bn_scale, bn_shift=bn_shift,
                wh=wh, bh=bh, ww=ww, bw=bw)


def ca_block_ref(x, p):
    """Pure-JAX reference mirroring the PyTorch forward (BN applied explicitly)."""
    n, c, h, w = x.shape
    x_h = jnp.mean(x, axis=3)                                   # (N, C, H)
    x_w = jnp.mean(x, axis=2)                                   # (N, C, W)
    y = jnp.concatenate([x_h, x_w], axis=2)                     # (N, C, H+W)
    y = jnp.einsum("mc,ncp->nmp", p["w1"], y) + p["b1"][None]
    y = _hswish(y * p["bn_scale"][None] + p["bn_shift"][None])
    y_h, y_w = y[:, :, :h], y[:, :, h:]
    a_h = jax.nn.sigmoid(jnp.einsum("cm,nmh->nch", p["wh"], y_h) + p["bh"][None])
    a_w = jax.nn.sigmoid(jnp.einsum("cm,nmw->ncw", p["ww"], y_w) + p["bw"][None])
    return x * a_h[:, :, :, None] * a_w[:, :, None, :]


if __name__ == "__main__":
    N, C, H, W = 2, 32, 16, 16          # reduction=16 -> mid channels = 2
    key = jax.random.PRNGKey(0)
    kx, kp = jax.random.split(key)
    x = jax.random.normal(kx, (N, C, H, W), jnp.float32)
    params = make_params(kp, C, reduction=16)

    ref = ca_block_ref(x, params)

    # f32 HBM I/O (matches the PyTorch module).
    out = ca_block(x, params)
    jax.block_until_ready(out)
    assert out.shape == (N, C, H, W)
    assert out.dtype == jnp.float32
    assert jnp.allclose(out, ref, atol=1e-4, rtol=1e-4), "f32 mismatch vs reference"

    # bf16 HBM I/O path (halved memory traffic; f32 accumulation in-kernel).
    out_bf16 = ca_block(x, params, io_dtype=jnp.bfloat16)
    jax.block_until_ready(out_bf16)
    assert out_bf16.dtype == jnp.bfloat16
    assert jnp.allclose(out_bf16.astype(jnp.float32), ref, atol=5e-2, rtol=5e-2), \
        "bf16 mismatch vs reference"

    print("KERNEL_OK")
</pallas_src>

<mosaic_0001>
module attributes {stable_mosaic.version = 11 : i64} {
  func.func @ca_kernel(%arg0: i32, %arg1: memref<1x32x256xf32, #tpu.memory_space<vmem>>, %arg2: memref<256x32xf32, #tpu.memory_space<vmem>>, %arg3: memref<16x256xf32, #tpu.memory_space<vmem>>, %arg4: memref<16x256xf32, #tpu.memory_space<vmem>>, %arg5: memref<32x2xf32, #tpu.memory_space<vmem>>, %arg6: memref<1x2xf32, #tpu.memory_space<vmem>>, %arg7: memref<2x32xf32, #tpu.memory_space<vmem>>, %arg8: memref<1x32xf32, #tpu.memory_space<vmem>>, %arg9: memref<2x32xf32, #tpu.memory_space<vmem>>, %arg10: memref<1x32xf32, #tpu.memory_space<vmem>>, %arg11: memref<1x32x256xf32, #tpu.memory_space<vmem>>) attributes {dimension_semantics = [#tpu.dimension_semantics<parallel>], iteration_bounds = array<i64: 2>, scalar_prefetch = 0 : i64, scratch_operands = 0 : i64, tpu.core_type = #tpu.core_type<tc>, window_params = [{transform_indices = @transform_0, window_bounds = array<i64: 1, 32, 256>}, {pipeline_mode = #tpu.pipeline_mode<synchronous>, transform_indices = @transform_1, window_bounds = array<i64: 256, 32>}, {pipeline_mode = #tpu.pipeline_mode<synchronous>, transform_indices = @transform_2, window_bounds = array<i64: 16, 256>}, {pipeline_mode = #tpu.pipeline_mode<synchronous>, transform_indices = @transform_3, window_bounds = array<i64: 16, 256>}, {pipeline_mode = #tpu.pipeline_mode<synchronous>, transform_indices = @transform_4, window_bounds = array<i64: 32, 2>}, {pipeline_mode = #tpu.pipeline_mode<synchronous>, transform_indices = @transform_5, window_bounds = array<i64: 1, 2>}, {pipeline_mode = #tpu.pipeline_mode<synchronous>, transform_indices = @transform_6, window_bounds = array<i64: 2, 32>}, {pipeline_mode = #tpu.pipeline_mode<synchronous>, transform_indices = @transform_7, window_bounds = array<i64: 1, 32>}, {pipeline_mode = #tpu.pipeline_mode<synchronous>, transform_indices = @transform_8, window_bounds = array<i64: 2, 32>}, {pipeline_mode = #tpu.pipeline_mode<synchronous>, transform_indices = @transform_9, window_bounds = array<i64: 1, 32>}, {transform_indices = @transform_10, window_bounds = array<i64: 1, 32, 256>}]} {
    %c0 = arith.constant 0 : index
    %c0_0 = arith.constant 0 : index
    %c0_1 = arith.constant 0 : index
    %0 = vector.load %arg1[%c0, %c0_0, %c0_1] : memref<1x32x256xf32, #tpu.memory_space<vmem>>, vector<1x32x256xf32>
    %1 = vector.shape_cast %0 : vector<1x32x256xf32> to vector<32x256xf32>
    %c0_2 = arith.constant 0 : index
    %c0_3 = arith.constant 0 : index
    %2 = vector.load %arg2[%c0_2, %c0_3] : memref<256x32xf32, #tpu.memory_space<vmem>>, vector<256x32xf32>
    %cst = arith.constant dense<0.000000e+00> : vector<32x32xf32>
    %3 = tpu.matmul %1, %2, %cst {dimension_numbers = #tpu.dot_dimension_numbers<[1], [0], [0], [1], [0, 0, 1, 1], [], []>} : vector<32x256xf32>, vector<256x32xf32>, vector<32x32xf32> -> vector<32x32xf32>
    %4 = vector.shape_cast %3 : vector<32x32xf32> to vector<1x32x32xf32>
    %5 = tpu.transpose %4, [0, 2, 1] : vector<1x32x32xf32> -> vector<1x32x32xf32>
    %6 = vector.shape_cast %5 : vector<1x32x32xf32> to vector<32x32xf32>
    %c0_4 = arith.constant 0 : index
    %c0_5 = arith.constant 0 : index
    %7 = vector.load %arg5[%c0_4, %c0_5] : memref<32x2xf32, #tpu.memory_space<vmem>>, vector<32x2xf32>
    %cst_6 = arith.constant dense<0.000000e+00> : vector<32x2xf32>
    %8 = tpu.matmul %6, %7, %cst_6 {dimension_numbers = #tpu.dot_dimension_numbers<[1], [0], [0], [1], [0, 0, 1, 1], [], []>} : vector<32x32xf32>, vector<32x2xf32>, vector<32x2xf32> -> vector<32x2xf32>
    %c0_7 = arith.constant 0 : index
    %c0_8 = arith.constant 0 : index
    %9 = vector.load %arg6[%c0_7, %c0_8] : memref<1x2xf32, #tpu.memory_space<vmem>>, vector<1x2xf32>
    %10 = vector.broadcast %9 : vector<1x2xf32> to vector<32x2xf32>
    %11 = arith.addf %8, %10 : vector<32x2xf32>
    %cst_9 = arith.constant 3.000000e+00 : f32
    %12 = vector.broadcast %cst_9 : f32 to vector<32x2xf32>
    %13 = arith.addf %11, %12 : vector<32x2xf32>
    %cst_10 = arith.constant 0.000000e+00 : f32
    %cst_11 = arith.constant 6.000000e+00 : f32
    %14 = vector.broadcast %cst_10 : f32 to vector<32x2xf32>
    %15 = arith.maximumf %14, %13 : vector<32x2xf32>
    %16 = vector.broadcast %cst_11 : f32 to vector<32x2xf32>
    %17 = arith.minimumf %16, %15 : vector<32x2xf32>
    %18 = arith.mulf %11, %17 : vector<32x2xf32>
    %cst_12 = arith.constant 0.166666672 : f32
    %19 = vector.broadcast %cst_12 : f32 to vector<32x2xf32>
    %20 = arith.mulf %18, %19 : vector<32x2xf32>
    %21 = vector.shape_cast %20 : vector<32x2xf32> to vector<1x32x2xf32>
    %22 = vector.extract_strided_slice %21 {offsets = [0, 0, 0], sizes = [1, 16, 2], strides = [1, 1, 1]} : vector<1x32x2xf32> to vector<1x16x2xf32>
    %23 = vector.shape_cast %22 : vector<1x16x2xf32> to vector<16x2xf32>
    %24 = vector.extract_strided_slice %21 {offsets = [0, 16, 0], sizes = [1, 16, 2], strides = [1, 1, 1]} : vector<1x32x2xf32> to vector<1x16x2xf32>
    %25 = vector.shape_cast %24 : vector<1x16x2xf32> to vector<16x2xf32>
    %c0_13 = arith.constant 0 : index
    %c0_14 = arith.constant 0 : index
    %26 = vector.load %arg7[%c0_13, %c0_14] : memref<2x32xf32, #tpu.memory_space<vmem>>, vector<2x32xf32>
    %cst_15 = arith.constant dense<0.000000e+00> : vector<16x32xf32>
    %27 = tpu.matmul %23, %26, %cst_15 {dimension_numbers = #tpu.dot_dimension_numbers<[1], [0], [0], [1], [0, 0, 1, 1], [], []>} : vector<16x2xf32>, vector<2x32xf32>, vector<16x32xf32> -> vector<16x32xf32>
    %c0_16 = arith.constant 0 : index
    %c0_17 = arith.constant 0 : index
    %28 = vector.load %arg8[%c0_16, %c0_17] : memref<1x32xf32, #tpu.memory_space<vmem>>, vector<1x32xf32>
    %29 = vector.broadcast %28 : vector<1x32xf32> to vector<16x32xf32>
    %30 = arith.addf %27, %29 : vector<16x32xf32>
    %31 = arith.negf %30 : vector<16x32xf32>
    %32 = math.exp %31 : vector<16x32xf32>
    %cst_18 = arith.constant 1.000000e+00 : f32
    %33 = vector.broadcast %cst_18 : f32 to vector<16x32xf32>
    %34 = arith.addf %33, %32 : vector<16x32xf32>
    %35 = arith.divf %33, %34 : vector<16x32xf32>
    %c0_19 = arith.constant 0 : index
    %c0_20 = arith.constant 0 : index
    %36 = vector.load %arg9[%c0_19, %c0_20] : memref<2x32xf32, #tpu.memory_space<vmem>>, vector<2x32xf32>
    %cst_21 = arith.constant dense<0.000000e+00> : vector<16x32xf32>
    %37 = tpu.matmul %25, %36, %cst_21 {dimension_numbers = #tpu.dot_dimension_numbers<[1], [0], [0], [1], [0, 0, 1, 1], [], []>} : vector<16x2xf32>, vector<2x32xf32>, vector<16x32xf32> -> vector<16x32xf32>
    %c0_22 = arith.constant 0 : index
    %c0_23 = arith.constant 0 : index
    %38 = vector.load %arg10[%c0_22, %c0_23] : memref<1x32xf32, #tpu.memory_space<vmem>>, vector<1x32xf32>
    %39 = vector.broadcast %38 : vector<1x32xf32> to vector<16x32xf32>
    %40 = arith.addf %37, %39 : vector<16x32xf32>
    %41 = arith.negf %40 : vector<16x32xf32>
    %42 = math.exp %41 : vector<16x32xf32>
    %cst_24 = arith.constant 1.000000e+00 : f32
    %43 = vector.broadcast %cst_24 : f32 to vector<16x32xf32>
    %44 = arith.addf %43, %42 : vector<16x32xf32>
    %45 = arith.divf %43, %44 : vector<16x32xf32>
    %46 = vector.shape_cast %35 : vector<16x32xf32> to vector<1x16x32xf32>
    %47 = tpu.transpose %46, [0, 2, 1] : vector<1x16x32xf32> -> vector<1x32x16xf32>
    %48 = vector.shape_cast %47 : vector<1x32x16xf32> to vector<32x16xf32>
    %49 = vector.shape_cast %45 : vector<16x32xf32> to vector<1x16x32xf32>
    %50 = tpu.transpose %49, [0, 2, 1] : vector<1x16x32xf32> -> vector<1x32x16xf32>
    %51 = vector.shape_cast %50 : vector<1x32x16xf32> to vector<32x16xf32>
    %c0_25 = arith.constant 0 : index
    %c0_26 = arith.constant 0 : index
    %52 = vector.load %arg3[%c0_25, %c0_26] : memref<16x256xf32, #tpu.memory_space<vmem>>, vector<16x256xf32>
    %cst_27 = arith.constant dense<0.000000e+00> : vector<32x256xf32>
    %53 = tpu.matmul %48, %52, %cst_27 {dimension_numbers = #tpu.dot_dimension_numbers<[1], [0], [0], [1], [0, 0, 1, 1], [], []>} : vector<32x16xf32>, vector<16x256xf32>, vector<32x256xf32> -> vector<32x256xf32>
    %54 = arith.mulf %1, %53 : vector<32x256xf32>
    %c0_28 = arith.constant 0 : index
    %c0_29 = arith.constant 0 : index
    %55 = vector.load %arg4[%c0_28, %c0_29] : memref<16x256xf32, #tpu.memory_space<vmem>>, vector<16x256xf32>
    %cst_30 = arith.constant dense<0.000000e+00> : vector<32x256xf32>
    %56 = tpu.matmul %51, %55, %cst_30 {dimension_numbers = #tpu.dot_dimension_numbers<[1], [0], [0], [1], [0, 0, 1, 1], [], []>} : vector<32x16xf32>, vector<16x256xf32>, vector<32x256xf32> -> vector<32x256xf32>
    %57 = arith.mulf %54, %56 : vector<32x256xf32>
    %58 = vector.shape_cast %57 : vector<32x256xf32> to vector<1x32x256xf32>
    %c0_31 = arith.constant 0 : index
    %c0_32 = arith.constant 0 : index
    %c0_33 = arith.constant 0 : index
    %59 = vector.load %arg11[%c0_31, %c0_32, %c0_33] : memref<1x32x256xf32, #tpu.memory_space<vmem>>, vector<1x32x256xf32>
    tpu.vector_store %arg11[%c0_31, %c0_32, %c0_33], %58 {strides = array<i32>} : memref<1x32x256xf32, #tpu.memory_space<vmem>>, vector<1x32x256xf32>,
    return
  }
  func.func @transform_0(%arg0: i32) -> (i32, i32, i32) {
    %c0_i32 = arith.constant 0 : i32
    %c0_i32_0 = arith.constant 0 : i32
    %c0_i32_1 = arith.constant 0 : i32
    return %arg0, %c0_i32, %c0_i32_0 : i32, i32, i32
  }
  func.func @transform_1(%arg0: i32) -> (i32, i32) {
    %c0_i32 = arith.constant 0 : i32
    %c0_i32_0 = arith.constant 0 : i32
    %c0_i32_1 = arith.constant 0 : i32
    return %c0_i32, %c0_i32_0 : i32, i32
  }
  func.func @transform_2(%arg0: i32) -> (i32, i32) {
    %c0_i32 = arith.constant 0 : i32
    %c0_i32_0 = arith.constant 0 : i32
    %c0_i32_1 = arith.constant 0 : i32
    return %c0_i32, %c0_i32_0 : i32, i32
  }
  func.func @transform_3(%arg0: i32) -> (i32, i32) {
    %c0_i32 = arith.constant 0 : i32
    %c0_i32_0 = arith.constant 0 : i32
    %c0_i32_1 = arith.constant 0 : i32
    return %c0_i32, %c0_i32_0 : i32, i32
  }
  func.func @transform_4(%arg0: i32) -> (i32, i32) {
    %c0_i32 = arith.constant 0 : i32
    %c0_i32_0 = arith.constant 0 : i32
    %c0_i32_1 = arith.constant 0 : i32
    return %c0_i32, %c0_i32_0 : i32, i32
  }
  func.func @transform_5(%arg0: i32) -> (i32, i32) {
    %c0_i32 = arith.constant 0 : i32
    %c0_i32_0 = arith.constant 0 : i32
    %c0_i32_1 = arith.constant 0 : i32
    return %c0_i32, %c0_i32_0 : i32, i32
  }
  func.func @transform_6(%arg0: i32) -> (i32, i32) {
    %c0_i32 = arith.constant 0 : i32
    %c0_i32_0 = arith.constant 0 : i32
    %c0_i32_1 = arith.constant 0 : i32
    return %c0_i32, %c0_i32_0 : i32, i32
  }
  func.func @transform_7(%arg0: i32) -> (i32, i32) {
    %c0_i32 = arith.constant 0 : i32
    %c0_i32_0 = arith.constant 0 : i32
    %c0_i32_1 = arith.constant 0 : i32
    return %c0_i32, %c0_i32_0 : i32, i32
  }
  func.func @transform_8(%arg0: i32) -> (i32, i32) {
    %c0_i32 = arith.constant 0 : i32
    %c0_i32_0 = arith.constant 0 : i32
    %c0_i32_1 = arith.constant 0 : i32
    return %c0_i32, %c0_i32_0 : i32, i32
  }
  func.func @transform_9(%arg0: i32) -> (i32, i32) {
    %c0_i32 = arith.constant 0 : i32
    %c0_i32_0 = arith.constant 0 : i32
    %c0_i32_1 = arith.constant 0 : i32
    return %c0_i32, %c0_i32_0 : i32, i32
  }
  func.func @transform_10(%arg0: i32) -> (i32, i32, i32) {
    %c0_i32 = arith.constant 0 : i32
    %c0_i32_0 = arith.constant 0 : i32
    %c0_i32_1 = arith.constant 0 : i32
    return %arg0, %c0_i32, %c0_i32_0 : i32, i32, i32
  }
}

</mosaic_0001>

<bundles_post_ra>
// kernel: tpu_custom_call.1
= control target key start
LH: loop header
LB: loop body
LE: loop exit
PB: predicated region body
PF: predicated region fallthrough
CT: control target
= control target key end

     0   :  { %15 = vsyncpa [#allocation3], 0  ;;  %s1848_s0 = inlined_call_operand.vmem [shape: f32[2,32,256], index: 0, kind: input, shape index: {}]   ;;  %s1849_s1 = inlined_call_operand.vmem [shape: f32[256,32], index: 1, kind: input, shape index: {}]   ;;  %s1850_s2 = inlined_call_operand.vmem [shape: f32[16,256], index: 2, kind: input, shape index: {}]   ;;  %s1851_s3 = inlined_call_operand.vmem [shape: f32[16,256], index: 3, kind: input, shape index: {}]   ;;  %s1852_s4 = inlined_call_operand.vmem [shape: f32[32,2], index: 4, kind: input, shape index: {}]   ;;  %s1853_s5 = inlined_call_operand.vmem [shape: f32[1,2], index: 5, kind: input, shape index: {}]   ;;  %s1854_s6 = inlined_call_operand.vmem [shape: f32[2,32], index: 6, kind: input, shape index: {}]   ;;  %s1855_s7 = inlined_call_operand.vmem [shape: f32[1,32], index: 7, kind: input, shape index: {}]   ;;  %s1856_s8 = inlined_call_operand.vmem [shape: f32[2,32], index: 8, kind: input, shape index: {}]   ;;  %s1857_s9 = inlined_call_operand.vmem [shape: f32[1,32], index: 9, kind: input, shape index: {}]   ;;  %s1858_s10 = inlined_call_operand.hbm [shape: f32[2,32,256], index: 10, kind: output, shape index: {}]  }
   0x1   :  { %17 = vsyncpa [#allocation3 + $0x1], 0  ;;  %s1537_s13 = smov 0   ;;  %s1539_s14 = smov 0  }
   0x2   :  { %s1541_s15 = smov 0   ;;  %s1543_s16 = smov 0  }
   0x3 LB: > { %s1558_s17 = sadd.s32 4294967295, %s1476_s16   ;;  %s1229_s18 = sadd.s32 4294967294, %s1476_s16   ;;  %s1476_s16 = sphi %s1543_s16, %s1866_s16   ;;  %s1472_s15 = sphi %s1541_s15, %s1865_s15   ;;  %s1468_s14 = sphi %s1539_s14, %s1864_s14   ;;  %s1464_s13 = sphi %s1537_s13, %s1863_s13  }
   0x4   : > { %s1562_s19 = sadd.s32 1, %s1476_s16   ;;  %s245_s20 = sadd.s32 1, %s1472_s15 }
   0x5   : > { %s242_s21 = ssub.s32 %s1476_s16, %s1562_s19  ;;  %p255_p0 = scmp.ne.s32.totalorder %s1472_s15, %s1468_s14 }
   0x6   : > { %p243_p1 = scmp.eq.s32.totalorder %s242_s21, 0  ;;  %p256_p2 = scmp.eq.s32.totalorder %s1558_s17, 1 }
   0x7   : > { %p261_p3 = scmp.ne.s32.totalorder %s1468_s14, %s1464_s13  ;;  %p262_p4 = scmp.eq.s32.totalorder %s1229_s18, 1 }
   0x8   : > { %s1573_s22 = scalar_select %p243_p1, %s1472_s15, %s245_s20  }
   0x9   : > { %p1575_p5 = por %p256_p2, %p255_p0  ;;  %p1579_p6 = por %p262_p4, %p261_p3 }
   0xa   : > { %1859 = sst [smem:[#allocation5_spill]] %s1573_s22  ;;  %p1232_p7 = scmp.ge.s32.totalorder %s1476_s16, 1 }
   0xb   : > { %p315_p8 = scmp.lt.s32.totalorder %s1476_s16, 3 }
   0xd   : > { %p316_p9 = pnand %p1232_p7, %p315_p8 }
   0xe   : > { %p353_p10 = scmp.lt.s32.totalorder (!%p316_p9), %s1558_s17, 1  ;;  %s350_s25 = sand.u32 (!%p316_p9), 1, %s1468_s14  }
   0xf   : > { %319 = sbr.rel (%p316_p9) target bundleno = 1180 (0x49c), region = 60  ;;  %s1233_s26 = sshll.u32 (!%p316_p9), %s350_s25, 6 }
  0x10   : > { %s1267_s28 = sshll.u32 (!%p316_p9), %s1558_s17, 10  ;;  %s1479_s22 = smov (!%p316_p9), [#allocation2]  }
  0x11   : > { %s1802_s18 = scalar_lea.hbm (!%p316_p9), %s1858_s10, %s1267_s28 }
  0x14   : > { %v397_v0 = vld [vmem:[%s1849_s1 + $0xf8] sm:$0xff]  ;;  %v396_v2 = vld [vmem:[%s1849_s1 + $0xf0] sm:$0xff]  ;;  %v395_v4 = vld [vmem:[%s1849_s1 + $0xe8] sm:$0xff]  ;;  %s354_s21 = scalar_select %p353_p10, %s1558_s17, 1  ;;  %vm526_vm0 = vcmask 261120   ;;  %vm659_vm1 = vcmask 1041408  }
  0x15   : > { %v381_v1 = vld [vmem:[%s1849_s1 + $0x78] sm:$0xff]  ;;  %1268 = vmatprep.subr.mxu0 %v397_v0  ;;  %v380_v3 = vld [vmem:[%s1849_s1 + $0x70] sm:$0xff]  ;;  %v379_v5 = vld [vmem:[%s1849_s1 + $0x68] sm:$0xff]  ;;  %vm652_vm2 = vcmask 15360   ;;  %vm922_vm3 = vcmask 130048   ;;  %s1808_s17 = scalar_lea.sflag [#allocation3], %s350_s25 }
  0x16   : > { %1269 = vmatpush3.msra.mxu0 %v381_v1  ;;  %v394_v6 = vld [vmem:[%s1849_s1 + $0xe0] sm:$0xff]  ;;  %s1266_s29 = sshll.u32 %s354_s21, 6  ;;  %v393_v8 = vld [vmem:[%s1849_s1 + $0xd8] sm:$0xff]  ;;  %v392_v10 = vld [vmem:[%s1849_s1 + $0xd0] sm:$0xff]  ;;  %s352_s21 = scalar_lea.vmem [#allocation2], %s1233_s26 }
  0x17   : > { %1270 = vmatprep.subr.mxu0 %v396_v2  ;;  %v378_v7 = vld [vmem:[%s1849_s1 + $0x60] sm:$0xff]  ;;  %v377_v9 = vld [vmem:[%s1849_s1 + $0x58] sm:$0xff]  ;;  %s1620_s27 = scalar_lea.vmem %s1848_s0, %s1266_s29  ;;  %v376_v11 = vld [vmem:[%s1849_s1 + $0x50] sm:$0xff]  ;;  %s1167_s30 = sshll.u32 %s352_s21, 4  ;;  %s1804_s30 = int_to_ptr.vmem [resolvable:$true] %s1167_s30 }
  0x18   : > { %1271 = vmatpush3.msra.mxu0 %v380_v3  ;;  %v391_v12 = vld [vmem:[%s1849_s1 + $0xc8] sm:$0xff]  ;;  %v390_v15 = vld [vmem:[%s1849_s1 + $0xc0] sm:$0xff]  ;;  %v389_v17 = vld [vmem:[%s1849_s1 + $0xb8] sm:$0xff]  ;;  %s1420_s29 = sshll.u32 %s1479_s22, 4  ;;  %s1421_s29 = int_to_ptr.vmem [resolvable:$false] %s1420_s29 }
  0x19   : > { %1272 = vmatprep.subr.mxu0 %v395_v4  ;;  %v1632_v13 = vld [vmem:[%s1620_s27 + $0x8] sm:$0xff]  ;;  %v374_v16 = vld [vmem:[%s1849_s1 + $0x40] sm:$0xff]  ;;  %v373_v18 = vld [vmem:[%s1849_s1 + $0x38] sm:$0xff]  ;;  %s1422_s20 = scalar_lea.vmem %s1421_s29, 2048  ;;  %p1423_p0 = scmp.lt.s32.totalorder %s1804_s30, %s1421_s29 }
  0x1a   : > { %1273 = vmatpush3.msra.mxu0 %v379_v5  ;;  %v375_v14 = vld [vmem:[%s1849_s1 + $0x48] sm:$0xff]  ;;  %462 = vmatprep.mubr.f32.mxu0 %v1632_v13  ;;  %v388_v19 = vld [vmem:[%s1849_s1 + $0xb0] sm:$0xff]  ;;  %v386_v23 = vld [vmem:[%s1849_s1 + $0xa0] sm:$0xff] }
  0x1b   : > { %1274 = vmatprep.subr.mxu0 %v394_v6  ;;  %v372_v20 = vld [vmem:[%s1849_s1 + $0x30] sm:$0xff]  ;;  %v387_v21 = vld [vmem:[%s1849_s1 + $0xa8] sm:$0xff]  ;;  %v370_v24 = vld [vmem:[%s1849_s1 + $0x20] sm:$0xff] }
  0x1c   : > { %1275 = vmatpush3.msra.mxu0 %v378_v7  ;;  %v371_v22 = vld [vmem:[%s1849_s1 + $0x28] sm:$0xff]  ;;  %v385_v25 = vld [vmem:[%s1849_s1 + $0x98] sm:$0xff]  ;;  %v384_v27 = vld [vmem:[%s1849_s1 + $0x90] sm:$0xff] }
  0x1d   : > { %1276 = vmatprep.subr.mxu0 %v393_v8  ;;  %v369_v26 = vld [vmem:[%s1849_s1 + $0x18] sm:$0xff]  ;;  %v368_v28 = vld [vmem:[%s1849_s1 + $0x10] sm:$0xff]  ;;  %v383_v29 = vld [vmem:[%s1849_s1 + $0x88] sm:$0xff] }
  0x1e   : > { %1277 = vmatpush3.msra.mxu0 %v377_v9  ;;  %v367_v30 = vld [vmem:[%s1849_s1 + $0x8] sm:$0xff]  ;;  %v382_v31 = vld [vmem:[%s1849_s1 + $0x80] sm:$0xff]  ;;  %v1696_v34 = vld [vmem:[%s1620_s27 + $0x18] sm:$0xff] }
  0x1f   : > { %1278 = vmatprep.subr.mxu0 %v392_v10  ;;  %v366_v32 = vld [vmem:[%s1849_s1] sm:$0xff]  ;;  %v1701_v35 = vld [vmem:[%s1620_s27 + $0x10] sm:$0xff]  ;;  %v1704_v36 = vld [vmem:[%s1620_s27 + $0x28] sm:$0xff] }
  0x20   : > { %1279 = vmatpush3.msra.mxu0 %v376_v11  ;;  %v1693_v33 = vld [vmem:[%s1620_s27] sm:$0xff]  ;;  %v1712_v38 = vld [vmem:[%s1620_s27 + $0x38] sm:$0xff]  ;;  %v1717_v39 = vld [vmem:[%s1620_s27 + $0x30] sm:$0xff] }
  0x21   : > { %1280 = vmatprep.subr.mxu0 %v391_v12  ;;  %v1709_v37 = vld [vmem:[%s1620_s27 + $0x20] sm:$0xff]  ;;  %v518_v40 = vld [vmem:[%s1852_s4 + $0x18] sm:$0xff]  ;;  %v517_v41 = vld [vmem:[%s1852_s4 + $0x10] sm:$0xff]  ;;  %s1416_s27 = scalar_lea.vmem %s1804_s30, 1024 }
  0x22   : > { %1281 = vmatpush3.msra.mxu0 %v375_v14  ;;  %1350 = vmatprep.subr.mxu1 %v518_v40  ;;  %v516_v42 = vld [vmem:[%s1852_s4 + $0x8] sm:$0xff]  ;;  %v515_v43 = vld [vmem:[%s1852_s4] sm:$0xff]  ;;  %p1417_p11 = scmp.ne.s32.totalorder %s1804_s30, %s1416_s27  ;;  %p1424_p1 = scmp.lt.s32.totalorder %s1422_s20, %s1416_s27 }
  0x23   : > { %1282 = vmatprep.subr.mxu0 %v390_v15  ;;  %1354 = vmatpush3.msra.mxu1 %v518_v40  ;;  %v644_v60 = vld [vmem:[%s1854_s6] sm:$0x3] }
  0x24   : > { %1283 = vmatpush3.msra.mxu0 %v374_v16  ;;  %1351 = vmatprep.subr.mxu1 %v517_v41  ;;  %v750_v61 = vld [vmem:[%s1856_s8] sm:$0x3]  ;;  %p1418_p12 = pnand %p1417_p11, %p1575_p5  ;;  %p1425_p2 = por %p1424_p1, %p1423_p0 }
  0x25   : > { %1284 = vmatprep.subr.mxu0 %v389_v17  ;;  %1355 = vmatpush3.msra.mxu1 %v517_v41  ;;  %v1236_v62 = vld [vmem:[%s1853_s5] ss:$0 sm:$0xff] }
  0x26   : > { %1285 = vmatpush3.msra.mxu0 %v373_v18  ;;  %1352 = vmatprep.subr.mxu1 %v516_v42  ;;  %p1419_p13 = pneg %p1418_p12 }
  0x27   : > { %1286 = vmatprep.subr.mxu0 %v388_v19  ;;  %1356 = vmatpush3.msra.mxu1 %v516_v42 }
  0x28   : > { %1287 = vmatpush3.msra.mxu0 %v372_v20  ;;  %1353 = vmatprep.subr.mxu1 %v515_v43  ;;  %p1426_p3 = pnand %p1425_p2, %p1419_p13 }
  0x29   : > { %1288 = vmatprep.subr.mxu0 %v387_v21  ;;  %1357 = vmatpush3.msra.mxu1 %v515_v43 }
  0x2a   : > { %1289 = vmatpush3.msra.mxu0 %v371_v22  ;;  %1340 = vmatprep.subr.msk.mxu1 %vm659_vm1, %v644_v60 }
  0x2b   : > { %1290 = vmatprep.subr.mxu0 %v386_v23 }
  0x2c   : > { %1291 = vmatpush3.msra.mxu0 %v370_v24 }
  0x2d   : > { %1292 = vmatprep.subr.mxu0 %v385_v25 }
  0x2e   : > { %1293 = vmatpush3.msra.mxu0 %v369_v26 }
  0x2f   : > { %1294 = vmatprep.subr.mxu0 %v384_v27 }
  0x30   : > { %1295 = vmatpush3.msra.mxu0 %v368_v28  ;;  %v921_v28 = vld [vmem:[%s1850_s2 + $0x18] sm:$0xff] }
  0x31   : > { %1296 = vmatprep.subr.mxu0 %v383_v29  ;;  %v920_v29 = vld [vmem:[%s1850_s2 + $0x10] sm:$0xff] }
  0x32   : > { %1297 = vmatpush3.msra.mxu0 %v367_v30  ;;  %v919_v30 = vld [vmem:[%s1850_s2 + $0x8] sm:$0xff] }
  0x33   : > { %1298 = vmatprep.subr.mxu0 %v382_v31  ;;  %v918_v31 = vld [vmem:[%s1850_s2] sm:$0xff] }
  0x34   : > { %1299 = vmatpush3.msra.mxu0 %v366_v32  ;;  %v1241_v32 = vld [vmem:[%s1855_s7] ss:$0 sm:$0xff] }
  0x35   : > { %463 = vmatmul.mubr.f32.vlgmr.msra.gmra.mxu0 %v1693_v33  ;;  %1326 = vmatprep.subr.mxu0 %v518_v40 }
  0x36   : > { %467 = vmatprep.mubr.f32.mxu0 %v1696_v34  ;;  %1327 = vmatpush3.msra.mxu0 %v518_v40 }
  0x37   : > { %1328 = vmatprep.subr.mxu0 %v517_v41 }
  0x38   : > { %1329 = vmatpush3.msra.mxu0 %v517_v41 }
  0x39   : > { %468 = vmatmul.mubr.f32.gmra.mxu0 %v1701_v35  ;;  %1330 = vmatprep.subr.mxu0 %v516_v42 }
  0x3a   : > { %472 = vmatprep.mubr.f32.mxu0 %v1704_v36  ;;  %1331 = vmatpush3.msra.mxu0 %v516_v42 }
  0x3b   : > { %1332 = vmatprep.subr.mxu0 %v515_v43 }
  0x3c   : > { %1333 = vmatpush3.msra.mxu0 %v515_v43 }
  0x3d   : > { %473 = vmatmul.mubr.f32.gmra.mxu0 %v1709_v37 }
  0x3e   : > { %477 = vmatprep.mubr.f32.mxu0 %v1712_v38 }
  0x41   : > { %478 = vmatmul.mubr.f32.gmra.mxu0 %v1717_v39 }
  0xf5   : > { %v1300_v44 = vpop.f32.mrf.mxu0 }
  0xf7   : > { %v1301_v45 = vpop.f32.mrf.mxu0 }
  0xf8   : > { %v1302_v46 = vadd.f32 %v1301_v45, %v1300_v44 }
  0xf9   : > { %v1303_v47 = vpop.f32.mrf.mxu0 }
  0xfa   : > { %483 = vxpose.xlu0.b32.start [1/4] (short) (narrow) %v1302_v46, 32 }
  0xfb   : > { %v1304_v48 = vpop.f32.mrf.mxu0 }
  0xfc   : > { %v1305_v49 = vadd.f32 %v1304_v48, %v1303_v47  ;;  %v1247_v47 = vld [vmem:[%s1857_s9] ss:$0 sm:$0xff] }
  0xfd   : > { %v1306_v50 = vpop.f32.mrf.mxu0 }
  0xfe   : > { %484 = vxpose.xlu0.b32.cont [2/4] (short) (narrow) %v1305_v49, 32 }
  0xff   : > { %v1307_v51 = vpop.f32.mrf.mxu0 }
 0x100   : > { %v1308_v52 = vadd.f32 %v1307_v51, %v1306_v50 }
 0x101   : > { %v1309_v53 = vpop.f32.mrf.mxu0 }
 0x102   : > { %485 = vxpose.xlu0.b32.cont [3/4] (short) (narrow) %v1308_v52, 32 }
 0x103   : > { %v1310_v54 = vpop.f32.mrf.mxu0 }
 0x104   : > { %v1311_v55 = vadd.f32 %v1310_v54, %v1309_v53 }
 0x106   : > { %486 = vxpose.xlu0.b32.end [4/4] (short) (narrow) %v1311_v55, 32 }
 0x176   : > { %v499_v56 = vpop.trf.xlu0 }
 0x177   : > { %1334 = vmatprep.mubr.msk.f32.mxu0 %vm526_vm0, %v499_v56 }
 0x17a   : > { %v500_v57 = vpop.trf.xlu0 }
 0x17b   : > { %1335 = vmatmul.mubr.msk.f32.vlgmr.msra.gmra.mxu0 %vm526_vm0, %v500_v57 }
 0x17e   : > { %v501_v58 = vpop.trf.xlu0 }
 0x17f   : > { %1337 = vmatprep.mubr.msk.f32.mxu1 %vm526_vm0, %v501_v58 }
 0x182   : > { %v502_v59 = vpop.trf.xlu0 }
 0x183   : > { %1338 = vmatmul.mubr.msk.f32.vlgmr.msra.gmra.mxu1 %vm526_vm0, %v502_v59 }
 0x184   : > { %1341 = vmatpush3.msk.msra.mxu1 %vm659_vm1, %v644_v60  ;;  %v1478_v60 = vmov 0.0  }
 0x185   : > { %1345 = vmatprep.subr.msk.mxu1 %vm659_vm1, %v750_v61 }
 0x23b   : > { %v1336_v63 = vpop.f32.mrf.mxu0 }
 0x23c   : > { %v611_v0 = vadd.f32 %v1336_v63, %v1236_v62 }
 0x23d   : > { %v605_v1 = vpop.f32.mrf.mxu0 }
 0x23e   : > { %v625_v2 = vadd.f32 3.0, %v611_v0  ;;  %v606_v3 = vadd.f32 %v1236_v62, %v605_v1 }
 0x240   : > { %v629_v4 = vmax.f32 %v625_v2, 0.0  ;;  %v624_v5 = vadd.f32 3.0, %v606_v3 }
 0x242   : > { %v633_v6 = vmin.f32 %v629_v4, 6.0  ;;  %v628_v7 = vmax.f32 %v624_v5, 0.0  ;;  %v1033_v5 = vld [vmem:[%s1851_s3 + $0x8] sm:$0xff] }
 0x243   : > { %v1339_v8 = vpop.f32.mrf.mxu1 }
 0x244   : > { %v632_v9 = vmin.f32 %v628_v7, 6.0  ;;  %v621_v10 = vadd.f32 %v1339_v8, %v1236_v62  ;;  %v637_v11 = vmul.f32 %v633_v6, %v611_v0  ;;  %v1032_v6 = vld [vmem:[%s1851_s3] sm:$0xff] }
 0x245   : > { %v615_v12 = vpop.f32.mrf.mxu1 }
 0x246   : > { %v636_v14 = vmul.f32 %v632_v9, %v606_v3  ;;  %v627_v15 = vadd.f32 3.0, %v621_v10  ;;  %v616_v16 = vadd.f32 %v1236_v62, %v615_v12  ;;  %v641_v20 = vmul.f32 0.16666667, %v637_v11  ;;  %v1034_v3 = vld [vmem:[%s1851_s3 + $0x10] sm:$0xff] }
 0x248   : > { %v640_v17 = vmul.f32 0.16666667, %v636_v14  ;;  %v631_v18 = vmax.f32 %v627_v15, 0.0  ;;  %v626_v19 = vadd.f32 3.0, %v616_v16 }
 0x24a   : > { %v635_v21 = vmin.f32 %v631_v18, 6.0  ;;  %v630_v22 = vmax.f32 %v626_v19, 0.0  ;;  %1342 = vmatprep.mubr.msk.f32.mxu1 %vm652_vm2, %v640_v17 }
 0x24b   : > { %1343 = vmatmul.mubr.msk.f32.vlgmr.msra.gmra.mxu1 %vm652_vm2, %v641_v20 }
 0x24c   : > { %v639_v23 = vmul.f32 %v635_v21, %v621_v10  ;;  %v634_v24 = vmin.f32 %v630_v22, 6.0  ;;  %1346 = vmatpush3.msk.msra.mxu1 %vm659_vm1, %v750_v61  ;;  %v1035_v61 = vld [vmem:[%s1851_s3 + $0x18] sm:$0xff] }
 0x24d   : > { %963 = vmatprep.subr.mxu1 %v921_v28 }
 0x24e   : > { %v638_v25 = vmul.f32 %v634_v24, %v616_v16  ;;  %v643_v26 = vmul.f32 0.16666667, %v639_v23 }
 0x250   : > { %v642_v27 = vmul.f32 0.16666667, %v638_v25 }
 0x252   : > { %1347 = vmatprep.mubr.msk.f32.mxu1 %vm652_vm2, %v642_v27 }
 0x253   : > { %1348 = vmatmul.mubr.msk.f32.vlgmr.msra.gmra.mxu1 %vm652_vm2, %v643_v26 }
 0x254   : > { %964 = vmatpush1.msra.mxu1 %v920_v29  ;;  %999 = vmatprep.mubr.f32.mxu1 %v1478_v60 }
 0x255   : > { %965 = vmatprep.subr.mxu1 %v919_v30 }
 0x256   : > { %966 = vmatpush1.msra.mxu1 %v918_v31 }
 0x257   : > { %1076 = vmatprep.subr.mxu1 %v1035_v61 }
 0x30b   : > { %v1344_v40 = vpop.f32.mrf.mxu1 }
 0x30c   : > { %v735_v41 = vadd.f32 %v1344_v40, %v1241_v32 }
 0x30d   : > { %v729_v42 = vpop.f32.mrf.mxu1 }
 0x30e   : > { %v1246_v43 = vmul.f32 -1.442695, %v735_v41  ;;  %v730_v44 = vadd.f32 %v1241_v32, %v729_v42 }
 0x310   : > { %v1245_v45 = vmul.f32 -1.442695, %v730_v44  ;;  %1400 = vpow2.f32 %v1246_v43 }
 0x312   : > { %1402 = vpow2.f32 %v1245_v45 }
 0x313   : > { %v1349_v46 = vpop.f32.mrf.mxu1 }
 0x314   : > { %v839_v50 = vadd.f32 %v1349_v46, %v1247_v47 }
 0x315   : > { %v833_v48 = vpop.f32.mrf.mxu1 }
 0x316   : > { %v834_v49 = vadd.f32 %v1247_v47, %v833_v48  ;;  %v1252_v52 = vmul.f32 -1.442695, %v839_v50 }
 0x318   : > { %v1251_v51 = vmul.f32 -1.442695, %v834_v49 }
 0x31a   : > { %1404 = vpow2.f32 %v1251_v51 }
 0x31b   : > { %1406 = vpow2.f32 %v1252_v52 }
 0x31d   : > { %v1401_v53 = vpop.eup %1400 }
 0x31e   : > { %v745_v56 = vadd.f32 1.0, %v1401_v53 }
 0x31f   : > { %v1403_v54 = vpop.eup %1402 }
 0x320   : > { %v744_v55 = vadd.f32 1.0, %v1403_v54 }
 0x322   : > { %1408 = vrcp.f32 %v744_v55 }
 0x323   : > { %1410 = vrcp.f32 %v745_v56 }
 0x327   : > { %v1405_v57 = vpop.eup %1404 }
 0x328   : > { %v848_v58 = vadd.f32 1.0, %v1405_v57  ;;  %v1407_v59 = vpop.eup %1406 }
 0x329   : > { %v849_v63 = vadd.f32 1.0, %v1407_v59 }
 0x32a   : > { %1412 = vrcp.f32 %v848_v58 }
 0x32b   : > { %1414 = vrcp.f32 %v849_v63 }
 0x32f   : > { %v1409_v62 = vpop.eup %1408 }
 0x330   : > { %854 = vxpose.xlu1.b32.start [1/2] (short) (narrow) %v1409_v62, 32  ;;  %v1411_v0 = vpop.eup %1410 }
 0x334   : > { %855 = vxpose.xlu1.b32.end [2/2] (short) (narrow) %v1411_v0, 32 }
 0x337   : > { %v1413_v1 = vpop.eup %1412 }
 0x338   : > { %v1415_v2 = vpop.eup %1414 }
 0x33d   : > { %886 = vxpose.xlu1.b32.start [1/2] (short) (narrow) %v1413_v1, 32 }
 0x341   : > { %887 = vxpose.xlu1.b32.end [2/2] (short) (narrow) %v1415_v2, 32 }
 0x3ac   : > { %v870_v4 = vpop.trf.xlu1 }
 0x3ad   : > { %1253 = vmatmul.mubr.msk.f32.vlgmr.msra.gmra.mxu1 %vm922_vm3, %v870_v4 }
 0x3ae   : > { %1077 = vmatpush1.msra.mxu1 %v1034_v3  ;;  %1005 = vmatprep.mubr.f32.mxu1 %v1478_v60 }
 0x3af   : > { %1078 = vmatprep.subr.mxu1 %v1033_v5 }
 0x3b0   : > { %v871_v7 = vpop.trf.xlu1  ;;  %1079 = vmatpush1.msra.mxu1 %v1032_v6 }
 0x3b1   : > { %1254 = vmatmul.mubr.msk.f32.gmra.mxu1 %vm922_vm3, %v871_v7 }
 0x3b2   : > { %1011 = vmatprep.mubr.f32.mxu1 %v1478_v60 }
 0x3b4   : > { %v872_v8 = vpop.trf.xlu1 }
 0x3b5   : > { %1255 = vmatmul.mubr.msk.f32.gmra.mxu1 %vm922_vm3, %v872_v8 }
 0x3b6   : > { %1017 = vmatprep.mubr.f32.mxu1 %v1478_v60 }
 0x3b8   : > { %v873_v9 = vpop.trf.xlu1 }
 0x3b9   : > { %1256 = vmatmul.mubr.msk.f32.gmra.mxu1 %vm922_vm3, %v873_v9 }
 0x3ba   : > { %1112 = vmatprep.mubr.f32.mxu1 %v1478_v60 }
 0x3bc   : > { %v902_v10 = vpop.trf.xlu1 }
 0x3bd   : > { %1257 = vmatmul.mubr.msk.f32.vlgmr.msra.gmra.mxu1 %vm922_vm3, %v902_v10 }
 0x3be   : > { %1118 = vmatprep.mubr.f32.mxu1 %v1478_v60 }
 0x3c0   : > { %v903_v11 = vpop.trf.xlu1 }
 0x3c1   : > { %1258 = vmatmul.mubr.msk.f32.gmra.mxu1 %vm922_vm3, %v903_v11 }
 0x3c2   : > { %1124 = vmatprep.mubr.f32.mxu1 %v1478_v60 }
 0x3c4   : > { %v904_v12 = vpop.trf.xlu1 }
 0x3c5   : > { %1259 = vmatmul.mubr.msk.f32.gmra.mxu1 %vm922_vm3, %v904_v12 }
 0x3c6   : > { %1130 = vmatprep.mubr.f32.mxu1 %v1478_v60 }
 0x3c8   : > { %v905_v14 = vpop.trf.xlu1 }
 0x3c9   : > { %1260 = vmatmul.mubr.msk.f32.gmra.mxu1 %vm922_vm3, %v905_v14 }
 0x46d   : > { %v1001_v15 = vpop.f32.mrf.mxu1 }
 0x46e   : > { %v1024_v23 = vmul.f32 %v1001_v15, %v1693_v33 }
 0x46f   : > { %v1003_v16 = vpop.f32.mrf.mxu1 }
 0x470   : > { %v1025_v25 = vmul.f32 %v1003_v16, %v1632_v13 }
 0x471   : > { %v1007_v17 = vpop.f32.mrf.mxu1 }
 0x472   : > { %v1026_v28 = vmul.f32 %v1007_v17, %v1701_v35 }
 0x473   : > { %v1009_v18 = vpop.f32.mrf.mxu1 }
 0x474   : > { %v1027_v31 = vmul.f32 %v1009_v18, %v1696_v34 }
 0x475   : > { %v1013_v19 = vpop.f32.mrf.mxu1 }
 0x476   : > { %v1028_v41 = vmul.f32 %v1013_v19, %v1709_v37 }
 0x477   : > { %v1015_v20 = vpop.f32.mrf.mxu1 }
 0x478   : > { %v1029_v13 = vmul.f32 %v1015_v20, %v1704_v36 }
 0x479   : > { %v1019_v21 = vpop.f32.mrf.mxu1 }
 0x47a   : > { %v1030_v44 = vmul.f32 %v1019_v21, %v1717_v39 }
 0x47b   : > { %v1021_v22 = vpop.f32.mrf.mxu1 }
 0x47c   : > { %v1031_v46 = vmul.f32 %v1021_v22, %v1712_v38 }
 0x47d   : > { %v1114_v24 = vpop.f32.mrf.mxu1 }
 0x47e   : > { %v1137_v26 = vmul.f32 %v1114_v24, %v1024_v23 }
 0x47f   : > { %v1116_v27 = vpop.f32.mrf.mxu1 }
 0x480   : > { %1145 = vst [vmem:[%s352_s21] sm:$0xff] %v1137_v26  ;;  %v1138_v29 = vmul.f32 %v1116_v27, %v1025_v25 }
 0x481   : > { %v1120_v30 = vpop.f32.mrf.mxu1 }
 0x482   : > { %1146 = vst [vmem:[%s352_s21 + $0x8] sm:$0xff] %v1138_v29  ;;  %v1139_v32 = vmul.f32 %v1120_v30, %v1026_v28 }
 0x483   : > { %v1122_v40 = vpop.f32.mrf.mxu1 }
 0x484   : > { %1147 = vst [vmem:[%s352_s21 + $0x10] sm:$0xff] %v1139_v32  ;;  %v1140_v33 = vmul.f32 %v1122_v40, %v1027_v31 }
 0x485   : > { %v1126_v42 = vpop.f32.mrf.mxu1 }
 0x486   : > { %1148 = vst [vmem:[%s352_s21 + $0x18] sm:$0xff] %v1140_v33  ;;  %v1141_v43 = vmul.f32 %v1126_v42, %v1028_v41 }
 0x487   : > { %v1128_v35 = vpop.f32.mrf.mxu1 }
 0x488   : > { %1149 = vst [vmem:[%s352_s21 + $0x20] sm:$0xff] %v1141_v43  ;;  %v1142_v45 = vmul.f32 %v1128_v35, %v1029_v13 }
 0x489   : > { %v1132_v34 = vpop.f32.mrf.mxu1 }
 0x48a   : > { %1150 = vst [vmem:[%s352_s21 + $0x28] sm:$0xff] %v1142_v45  ;;  %v1143_v37 = vmul.f32 %v1132_v34, %v1030_v44 }
 0x48b   : > { %v1134_v47 = vpop.f32.mrf.mxu1 }
 0x48c   : > { %1151 = vst [vmem:[%s352_s21 + $0x30] sm:$0xff] %v1143_v37  ;;  %v1144_v36 = vmul.f32 %v1134_v47, %v1031_v46 }
 0x48e   : > { %1152 = vst [vmem:[%s352_s21 + $0x38] sm:$0xff] %v1144_v36 }
 0x48f   : > { %1429 = shalt.err (!%p1426_p3)
}
 0x490   : > { %s1430_s25 = scalar_lea.hbm %s1802_s18, 1024  ;;  %s1434_s28 = scalar_lea.hbm %s1858_s10, 2048 }
 0x491   : > { %p1431_p4 = scmp.ne.s32.totalorder %s1802_s18, %s1430_s25  ;;  %p1435_p9 = scmp.lt.s32.totalorder %s1802_s18, %s1858_s10 }
 0x492   : > { %p1436_p10 = scmp.lt.s32.totalorder %s1434_s28, %s1430_s25 }
 0x493   : > { %p1432_p7 = pnand %p1431_p4, %p1575_p5 }
 0x494   : > { %p1437_p11 = por %p1436_p10, %p1435_p9 }
 0x495   : > { %p1433_p8 = pneg %p1432_p7 }
 0x497   : > { %p1438_p12 = pnand %p1437_p11, %p1433_p8 }
 0x499   : > { %1441 = shalt.err (!%p1438_p12)
}
 0x49a   : > { %s1480_s27 = smov 256   ;;  %s1481_s22 = smov 16  }
 0x49b   : > { %1358 = dma.vmem_to_hbm [thread:$0]  (%p1575_p5), %s1804_s30, 1024, %s1802_s18, %s1808_s17, %s1480_s27, %s1480_s27, %s1481_s22  }
 0x49c PF: > { %p1364_p13 = scmp.ge.s32.totalorder %s1476_s16, 2  ;;  %s1182_s29 = sand.u32 1, %s1464_s13  }
 0x49d   : > { %s1183_s20 = scalar_lea.sflag [#allocation3], %s1182_s29 }
 0x49e   : > { %p1361_p0 = pnand %p1364_p13, %p1579_p6 }
 0x4a0   : > { %p1362_p1 = pneg %p1361_p0 }
 0x4a2   : > { %1459 = dma.done.wait (%p1362_p1), %s1183_s20, 1024  }
 0x4a3   : > { %1461 = vsyncadd (%p1362_p1), %s1183_s20, 4294966272  ;;  %s1862_s25 = sld [smem:[#allocation5_spill]]  ;;  %p20_p2 = scmp.ge.s32.totalorder %s1562_s19, 4  }
 0x4a4   : > { %s1863_s13 = smov %s1468_s14  ;;  %s1864_s14 = smov %s1472_s15 }
 0x4a5   : > { %s1866_s16 = smov %s1562_s19  ;;  %22 = sbr.rel (!%p20_p2) target bundleno = 3 (0x3), region = 95 }
 0x4a9   : > { %s1865_s15 = smov %s1862_s25 }
 0x4aa   :  { %1188 = vsyncpa [#allocation3], 1 }
 0x4ab   :  { %1190 = vsyncpa [#allocation3 + $0x1], 1 }

</bundles_post_ra>
